<compile_context>
chip_gen: v7x
topology: tpu7x:2x2x1
jax: 0.10.0
libtpu: 0.0.40
codegen_flags: <defaults>
</compile_context>

<pallas_src>
import functools

import jax
import jax.numpy as jnp
from jax.experimental import pallas as pl
from jax.experimental.pallas import tpu as pltpu


def _focal_softmax_partial_kernel(x_ref, t_ref, out_ref, *,
                                  n_rows, tile_n, tiles_per_split):
    # x_ref: (tile_n, C) logits block (HBM dtype), t_ref: (tile_n, 1) int32,
    # out_ref: (1, 8, 128) f32 per-core partial sum (resident across axis 1).
    c = pl.program_id(0)
    i = pl.program_id(1)

    @pl.when(i == 0)
    def _():
        out_ref[...] = jnp.zeros_like(out_ref)

    x_raw = x_ref[...]                                      # (tile_n, C)
    t = t_ref[...]                                          # (tile_n, 1) int32

    # Target-class logit via iota-compare + masked row-sum (no vector gather on
    # the TPU vector path). Done in the HBM dtype: exactly one nonzero per row,
    # so the narrow-precision sum is exact; only the (tile_n,1) result is cast.
    cls = jax.lax.broadcasted_iota(jnp.int32, x_raw.shape, 1)
    tgt_logit = jnp.sum(jnp.where(cls == t, x_raw, jnp.zeros_like(x_raw)),
                        axis=-1, keepdims=True).astype(jnp.float32)  # (tile_n,1)

    # Numerically stable row-wise logsumexp in f32 (lane reductions -> XLU,
    # exp -> EUP; v5e has no bf16 VPU/EUP so this path is always f32).
    x = x_raw.astype(jnp.float32)                           # (tile_n, C)
    m = jnp.max(x, axis=-1, keepdims=True)                  # (tile_n, 1)
    lse = m + jnp.log(jnp.sum(jnp.exp(x - m), axis=-1, keepdims=True))
    tgt_lp = tgt_logit - lse                                # target log-prob

    # Mask rows beyond the true batch. This covers both the genuine partial
    # last tile (tail rows of the block are undefined) and padded grid tiles
    # whose index_map was clamped onto the last real tile (all rows masked).
    tile_idx = c * tiles_per_split + i
    row = jax.lax.broadcasted_iota(jnp.int32, (tile_n, 1), 0) + tile_idx * tile_n
    tgt_lp = jnp.where(row < n_rows, tgt_lp, 0.0)

    # Lane-dense per-core partial accumulator (unmasked full-vreg store).
    out_ref[...] += jnp.sum(tgt_lp)


def focal_softmax_loss(logits, target, gamma=2, *, max_tile_n=None,
                       num_core_splits=2):
    """logits: (N, C) float (f32 or bf16), target: (N,) int class indices -> scalar f32."""
    N, C = logits.shape
    t2 = target.reshape(N, 1).astype(jnp.int32)

    itemsize = jnp.dtype(logits.dtype).itemsize
    # ~4 MiB of logits per block: DMA time (>~3 us) dwarfs the ~0.35 us/step
    # grid overhead, while double-buffered input + f32 temporaries stay well
    # inside v7x's 64 MiB per-TC VMEM (and trivially inside v5e/v6e's 128 MiB).
    budget_bytes = 4 << 20
    tile_n = max(8, (budget_bytes // max(1, C * itemsize)) // 8 * 8)
    if max_tile_n is not None:
        tile_n = max(8, (min(tile_n, int(max_tile_n)) // 8) * 8)
    if tile_n >= N:
        tile_n = N                      # full-extent block is always legal
    # TODO(synk): for enormous C (f32 C ~ 1M+) even an 8-row block double-
    # buffered exceeds v7x VMEM; that regime needs a 2-D grid over C with an
    # online logsumexp, not implemented here.

    num_tiles = pl.cdiv(N, tile_n)
    num_splits = max(1, min(int(num_core_splits), num_tiles))
    tiles_per_split = pl.cdiv(num_tiles, num_splits)
    last_tile = num_tiles - 1

    # Scoped-VMEM limit: double-buffered logits block + f32 temporaries +
    # slack, clamped to [16 MiB, 48 MiB] so it is safe on every generation
    # (v5e 128 MiB, v6e 128 MiB, v7x 64 MiB physical VMEM).
    per_block = tile_n * C * itemsize
    f32_tmp = tile_n * C * 4
    vmem_limit = int(min(max(2 * per_block + 4 * f32_tmp, 16 << 20), 48 << 20))

    def in_map(c, i):
        # Clamp padded grid tiles onto the last real tile: the DMA stays in
        # bounds and the kernel's row mask zeroes their contribution.
        return (jnp.minimum(c * tiles_per_split + i, last_tile), 0)

    kernel = functools.partial(_focal_softmax_partial_kernel,
                               n_rows=N, tile_n=tile_n,
                               tiles_per_split=tiles_per_split)

    partials = pl.pallas_call(
        kernel,
        out_shape=jax.ShapeDtypeStruct((num_splits, 8, 128), jnp.float32),
        grid_spec=pltpu.PrefetchScalarGridSpec(
            num_scalar_prefetch=0,
            grid=(num_splits, tiles_per_split),
            in_specs=[
                pl.BlockSpec((tile_n, C), in_map),
                pl.BlockSpec((tile_n, 1), in_map),
            ],
            out_specs=pl.BlockSpec((1, 8, 128), lambda c, i: (c, 0, 0)),
        ),
        compiler_params=pltpu.CompilerParams(
            dimension_semantics=("parallel", "arbitrary"),
            vmem_limit_bytes=vmem_limit),
    )(logits, t2)

    # Focal epilogue in plain JAX on the tiny per-core partial sums.
    total = jnp.sum(partials[:, 0, 0])          # sum of target log-probs
    logp = -total / N                           # mean cross-entropy
    p = jnp.exp(-logp)
    return (1.0 - p) ** int(gamma) * logp       # .mean() of a scalar == itself


def _reference(logits, target, gamma=2):
    # Pure-JAX reference mirroring torch.nn.CrossEntropyLoss + focal weighting.
    lp = jax.nn.log_softmax(logits.astype(jnp.float32), axis=-1)
    tgt_lp = jnp.take_along_axis(lp, target[:, None].astype(jnp.int32), axis=-1)[:, 0]
    logp = -jnp.mean(tgt_lp)
    p = jnp.exp(-logp)
    return (1.0 - p) ** gamma * logp


if __name__ == "__main__":
    key = jax.random.PRNGKey(0)
    k1, k2, k3, k4, k5, k6 = jax.random.split(key, 6)

    # Case 1: single full-extent tile (N=8, C=32), f32 logits.
    N1, C1 = 8, 32
    logits1 = jax.random.normal(k1, (N1, C1), dtype=jnp.float32)
    target1 = jax.random.randint(k2, (N1,), 0, C1, dtype=jnp.int32)
    out1 = jax.block_until_ready(focal_softmax_loss(logits1, target1, gamma=2))
    ref1 = _reference(logits1, target1, gamma=2)
    assert jnp.allclose(out1, ref1, rtol=1e-5, atol=1e-6), (out1, ref1)

    # Case 2: multi-tile, 2-way core split with a partial tile AND a padded
    # (clamped) grid slot: N=20, tile_n=8 -> 3 real tiles on a (2,2) grid,
    # bf16 logits in HBM (exercises the bf16 target-extraction path).
    N2, C2 = 20, 32
    logits2 = jax.random.normal(k3, (N2, C2), dtype=jnp.float32).astype(jnp.bfloat16)
    target2 = jax.random.randint(k4, (N2,), 0, C2, dtype=jnp.int32)
    out2 = jax.block_until_ready(
        focal_softmax_loss(logits2, target2, gamma=2, max_tile_n=8))
    ref2 = _reference(logits2.astype(jnp.float32), target2, gamma=2)
    assert jnp.allclose(out2, ref2, rtol=1e-4, atol=1e-5), (out2, ref2)

    # Case 3: C not a multiple of 128 plus one partial tile per core
    # (N=12, C=72, tile_n=8 -> one full + one 4-row tile across 2 cores).
    N3, C3 = 12, 72
    logits3 = jax.random.normal(k5, (N3, C3), dtype=jnp.float32)
    target3 = jax.random.randint(k6, (N3,), 0, C3, dtype=jnp.int32)
    out3 = jax.block_until_ready(
        focal_softmax_loss(logits3, target3, gamma=2, max_tile_n=8))
    ref3 = _reference(logits3, target3, gamma=2)
    assert jnp.allclose(out3, ref3, rtol=1e-5, atol=1e-6), (out3, ref3)

    print("KERNEL_OK")
</pallas_src>

<mosaic_0001>
module attributes {stable_mosaic.version = 11 : i64} {
  func.func @_focal_softmax_partial_kernel(%arg0: i32, %arg1: i32, %arg2: memref<8x32xf32, #tpu.memory_space<vmem>>, %arg3: memref<8x1xi32, #tpu.memory_space<vmem>>, %arg4: memref<1x8x128xf32, #tpu.memory_space<vmem>>) attributes {dimension_semantics = [#tpu.dimension_semantics<parallel>, #tpu.dimension_semantics<arbitrary>], iteration_bounds = array<i64: 1, 1>, scalar_prefetch = 0 : i64, scratch_operands = 0 : i64, tpu.core_type = #tpu.core_type<tc>, window_params = [{transform_indices = @transform_0, window_bounds = array<i64: 8, 32>}, {transform_indices = @transform_1, window_bounds = array<i64: 8, 1>}, {transform_indices = @transform_2, window_bounds = array<i64: 1, 8, 128>}]} {
    %c0_i32 = arith.constant 0 : i32
    %0 = arith.cmpi eq, %arg1, %c0_i32 : i32
    %1 = arith.extui %0 : i1 to i32
    %c0_i32_0 = arith.constant 0 : i32
    %2 = arith.cmpi ne, %1, %c0_i32_0 : i32
    scf.if %2 {
      %cst_16 = arith.constant 0.000000e+00 : f32
      %40 = vector.broadcast %cst_16 : f32 to vector<1x8x128xf32>
      %c0_17 = arith.constant 0 : index
      %c0_18 = arith.constant 0 : index
      %c0_19 = arith.constant 0 : index
      %41 = vector.load %arg4[%c0_17, %c0_18, %c0_19] : memref<1x8x128xf32, #tpu.memory_space<vmem>>, vector<1x8x128xf32>
      tpu.vector_store %arg4[%c0_17, %c0_18, %c0_19], %40 {strides = array<i32>} : memref<1x8x128xf32, #tpu.memory_space<vmem>>, vector<1x8x128xf32>,
    } else {
    }
    %c0 = arith.constant 0 : index
    %c0_1 = arith.constant 0 : index
    %3 = vector.load %arg2[%c0, %c0_1] : memref<8x32xf32, #tpu.memory_space<vmem>>, vector<8x32xf32>
    %c0_2 = arith.constant 0 : index
    %c0_3 = arith.constant 0 : index
    %4 = vector.load %arg3[%c0_2, %c0_3] : memref<8x1xi32, #tpu.memory_space<vmem>>, vector<8x1xi32>
    %5 = tpu.iota {dimensions = array<i32: 1>} : vector<8x32xi32>
    %6 = vector.broadcast %4 : vector<8x1xi32> to vector<8x32xi32>
    %7 = arith.cmpi eq, %5, %6 : vector<8x32xi32>
    %cst = arith.constant 0.000000e+00 : f32
    %8 = vector.broadcast %cst : f32 to vector<8x32xf32>
    %9 = arith.select %7, %3, %8 : vector<8x32xi1>, vector<8x32xf32>
    %cst_4 = arith.constant dense<0.000000e+00> : vector<8xf32>
    %10 = vector.multi_reduction <add>, %9, %cst_4 [1] : vector<8x32xf32> to vector<8xf32>
    %11 = vector.shape_cast %10 : vector<8xf32> to vector<8x1xf32>
    %cst_5 = arith.constant dense<0xFF800000> : vector<8xf32>
    %12 = vector.multi_reduction <maximumf>, %3, %cst_5 [1] : vector<8x32xf32> to vector<8xf32>
    %13 = vector.shape_cast %12 : vector<8xf32> to vector<8x1xf32>
    %14 = vector.broadcast %13 : vector<8x1xf32> to vector<8x32xf32>
    %15 = arith.subf %3, %14 : vector<8x32xf32>
    %16 = math.exp %15 : vector<8x32xf32>
    %cst_6 = arith.constant dense<0.000000e+00> : vector<8xf32>
    %17 = vector.multi_reduction <add>, %16, %cst_6 [1] : vector<8x32xf32> to vector<8xf32>
    %18 = vector.shape_cast %17 : vector<8xf32> to vector<8x1xf32>
    %19 = math.log %18 : vector<8x1xf32>
    %20 = arith.addf %13, %19 : vector<8x1xf32>
    %21 = arith.subf %11, %20 : vector<8x1xf32>
    %c1_i32 = arith.constant 1 : i32
    %22 = arith.muli %arg0, %c1_i32 : i32
    %23 = arith.addi %22, %arg1 : i32
    %24 = tpu.iota {dimensions = array<i32: 0>} : vector<8x1xi32>
    %c8_i32 = arith.constant 8 : i32
    %25 = arith.muli %23, %c8_i32 : i32
    %26 = vector.broadcast %25 : i32 to vector<8x1xi32>
    %27 = arith.addi %24, %26 : vector<8x1xi32>
    %c8_i32_7 = arith.constant 8 : i32
    %28 = vector.broadcast %c8_i32_7 : i32 to vector<8x1xi32>
    %29 = arith.cmpi slt, %27, %28 : vector<8x1xi32>
    %cst_8 = arith.constant 0.000000e+00 : f32
    %30 = vector.broadcast %cst_8 : f32 to vector<8x1xf32>
    %31 = arith.select %29, %21, %30 : vector<8x1xi1>, vector<8x1xf32>
    %c0_9 = arith.constant 0 : index
    %c0_10 = arith.constant 0 : index
    %c0_11 = arith.constant 0 : index
    %32 = vector.load %arg4[%c0_9, %c0_10, %c0_11] : memref<1x8x128xf32, #tpu.memory_space<vmem>>, vector<1x8x128xf32>
    %33 = vector.shape_cast %31 : vector<8x1xf32> to vector<1x8x1xf32>
    %cst_12 = arith.constant dense<0.000000e+00> : vector<1xf32>
    %34 = vector.multi_reduction <add>, %33, %cst_12 [1, 2] : vector<1x8x1xf32> to vector<1xf32>
    %35 = vector.shape_cast %34 : vector<1xf32> to vector<1x1x1xf32>
    %36 = vector.extract %35[0, 0, 0] : f32 from vector<1x1x1xf32>
    %37 = vector.broadcast %36 : f32 to vector<1x8x128xf32>
    %38 = arith.addf %32, %37 : vector<1x8x128xf32>
    %c0_13 = arith.constant 0 : index
    %c0_14 = arith.constant 0 : index
    %c0_15 = arith.constant 0 : index
    %39 = vector.load %arg4[%c0_13, %c0_14, %c0_15] : memref<1x8x128xf32, #tpu.memory_space<vmem>>, vector<1x8x128xf32>
    tpu.vector_store %arg4[%c0_13, %c0_14, %c0_15], %38 {strides = array<i32>} : memref<1x8x128xf32, #tpu.memory_space<vmem>>, vector<1x8x128xf32>,
    return
  }
  func.func @transform_0(%arg0: i32, %arg1: i32) -> (i32, i32) {
    %c1_i32 = arith.constant 1 : i32
    %0 = arith.muli %arg0, %c1_i32 : i32
    %1 = arith.addi %0, %arg1 : i32
    %c0_i32 = arith.constant 0 : i32
    %2 = arith.minsi %1, %c0_i32 : i32
    %c0_i32_0 = arith.constant 0 : i32
    %c0_i32_1 = arith.constant 0 : i32
    return %2, %c0_i32_0 : i32, i32
  }
  func.func @transform_1(%arg0: i32, %arg1: i32) -> (i32, i32) {
    %c1_i32 = arith.constant 1 : i32
    %0 = arith.muli %arg0, %c1_i32 : i32
    %1 = arith.addi %0, %arg1 : i32
    %c0_i32 = arith.constant 0 : i32
    %2 = arith.minsi %1, %c0_i32 : i32
    %c0_i32_0 = arith.constant 0 : i32
    %c0_i32_1 = arith.constant 0 : i32
    return %2, %c0_i32_0 : i32, i32
  }
  func.func @transform_2(%arg0: i32, %arg1: i32) -> (i32, i32, i32) {
    %c0_i32 = arith.constant 0 : i32
    %c0_i32_0 = arith.constant 0 : i32
    %c0_i32_1 = arith.constant 0 : i32
    return %arg0, %c0_i32, %c0_i32_0 : i32, i32, i32
  }
}

</mosaic_0001>

<bundles_post_ra>
// kernel: tpu_custom_call.1
= control target key start
LH: loop header
LB: loop body
LE: loop exit
PB: predicated region body
PF: predicated region fallthrough
CT: control target
= control target key end

     0   :  { %vm80_vm0 = vcmask 261120   ;;  %s218_s0 = inlined_call_operand.vmem [shape: f32[8,32], index: 0, kind: input, shape index: {}]   ;;  %s219_s1 = inlined_call_operand.vmem [shape: s32[8,1], index: 1, kind: input, shape index: {}]   ;;  %s220_s2 = inlined_call_operand.hbm [shape: f32[1,8,128], index: 2, kind: output, shape index: {}]  }
   0x1   :  { %v71_v0 = vld [vmem:[%s218_s0] sm:$0xff] }
   0x2   :  { %7 = vsyncpa [#allocation3], 0  ;;  %v84_v1 = vsel %vm80_vm0, %v71_v0, -inf  ;;  %v180_v2 = vmov 0   ;;  %v72_v3 = vld [vmem:[%s219_s1] sm:$0xff]  ;;  %v73_v7 = vlaneseq  ;;  %vm106_vm2 = vcmask 7168  }
   0x3   :  { %151 = vset.pattern.permute.xlu0 %v180_v2  ;;  %s181_s0 = smov [#allocation2]  }
   0x4   :  { %85 = vmax.xlane.f32.xlu0 %v84_v1  ;;  %v74_v8 = vand.u32 127, %v73_v7  ;;  %s126_s1 = sshll.u32 %s181_s0, 4  ;;  %s127_s1 = int_to_ptr.vmem [resolvable:$true] %s126_s1 }
   0x5   :  { %s156_s14 = scalar_lea.vmem %s127_s1, 128  ;;  %p161_p1 = scmp.lt.s32.totalorder %s127_s1, %s127_s1 }
   0x6   :  { %p157_p0 = scmp.ne.s32.totalorder %s127_s1, %s156_s14  ;;  %p162_p2 = scmp.lt.s32.totalorder %s156_s14, %s156_s14 }
   0x8   :  { %p163_p3 = por %p162_p2, %p161_p1 }
   0xa   :  { %p164_p4 = pnand %p163_p3, %p157_p0 }
  0x1a   :  { %76 = vperm.xlu0 %151, %v72_v3  }
  0x91   :  { %v86_v4 = vpop.xlane.xlu0 %85 }
  0x92   :  { %v87_v5 = vsub.f32 %v71_v0, %v86_v4 }
  0x94   :  { %v88_v6 = vmul.f32 1.442695, %v87_v5 }
  0x96   :  { %152 = vpow2.f32 %v88_v6 }
  0x99   :  { %v77_v9 = vpop.permute.xlu0 %76 }
  0x9a   :  { %vm78_vm1 = vcmp.eq.s32.totalorder %v74_v8, %v77_v9 }
  0x9b   :  { %v79_v11 = vsel %vm78_vm1, %v71_v0, 0.0 }
  0x9c   :  { %v81_v13 = vsel %vm80_vm0, %v79_v11, 0.0 }
  0xa0   :  { %v153_v10 = vpop.eup %152 }
  0xa1   :  { %v90_v12 = vsel %vm80_vm0, %v153_v10, 0.0 }
  0xa2   :  { %91 = vadd.xlane.f32.xlu1 %v90_v12 }
  0xa6   :  { %82 = vadd.xlane.f32.xlu1 %v81_v13 }
 0x12f   :  { %v92_v14 = vpop.xlane.xlu1 %91 }
 0x130   :  { %154 = vlog2.f32 %v92_v14 }
 0x133   :  { %v83_v17 = vpop.xlane.xlu1 %82 }
 0x13a   :  { %v155_v15 = vpop.eup %154 }
 0x13b   :  { %v94_v16 = vmul.f32 0.6931472, %v155_v15 }
 0x13d   :  { %v95_v18 = vadd.f32 %v94_v16, %v86_v4 }
 0x13f   :  { %v96_v19 = vsub.f32 %v83_v17, %v95_v18 }
 0x141   :  { %v107_v20 = vsel %vm106_vm2, %v96_v19, 0.0 }
 0x142   :  { %108 = vadd.xlane.f32.xlu1 %v107_v20 }
 0x1cf   :  { %v109_v21 = vpop.xlane.xlu1 %108 }
 0x1d0   :  { %v110_v22 = vrot.slane %v109_v21, 4 }
 0x1d2   :  { %v111_v23 = vadd.f32 %v110_v22, %v109_v21 }
 0x1d4   :  { %v112_v24 = vrot.slane %v111_v23, 2 }
 0x1d6   :  { %v113_v25 = vadd.f32 %v112_v24, %v111_v23 }
 0x1d8   :  { %v114_v26 = vrot.slane %v113_v25, 1 }
 0x1da   :  { %v115_v27 = vadd.f32 %v114_v26, %v113_v25 }
 0x1dc   :  { %146 = vpush %v115_v27 }
 0x20d   :  { %s147_s13 = spop %146 }
 0x20e   :  { %v117_v28 = vstv %s147_s13 }
 0x20f   :  { %119 = vst [vmem:[#allocation2] sm:$0xff] %v117_v28 }
 0x210   :  { %167 = shalt.err (!%p164_p4)
}
 0x211   :  { %s168_s17 = scalar_lea.hbm %s220_s2, 128 }
 0x212   :  { %p169_p5 = scmp.ne.s32.totalorder %s220_s2, %s168_s17  ;;  %p172_p6 = scmp.lt.u32.totalorder %s168_s17, %s220_s2 }
 0x214   :  { %p174_p7 = pnand %p172_p6, %p169_p5 }
 0x216   :  { %177 = shalt.err (!%p174_p7)
}
 0x217   :  { %129 = dma.vmem_to_hbm [thread:$0]  %s127_s1, 128, %s220_s2, [#allocation3]  }
 0x218   :  { %178 = dma.done.wait [#allocation3], 128  }
 0x219   :  { %179 = vsyncadd [#allocation3], 4294967168 }
 0x21a   :  { %133 = vsyncpa [#allocation3], 1 }

</bundles_post_ra>
